<compile_context>
chip_gen: v7x
topology: tpu7x:2x2x1
jax: 0.10.0
libtpu: 0.0.40
codegen_flags: <defaults>
</compile_context>

<pallas_src>
import functools

import jax
import jax.numpy as jnp
from jax.experimental import pallas as pl
from jax.experimental.pallas import tpu as pltpu

_LANE = 128
_SUBLANE = 8


def _round_up(v, m):
    return -(-v // m) * m


def _conv1d_deriv_kernel(w_ref, x_ref, o_ref, *, ksize):
    """Cross-correlation along the last axis with a length-`ksize` filter.

    w_ref : SMEM (ksize,) float32  -- derivative taps, 1/resol already folded in
    x_ref : VMEM (TN, L_pad)       -- input tile (L_pad = l_out_pad + ksize - 1)
    o_ref : VMEM (TN, l_out_pad)   -- output tile (lane-dense, multiple of 128)
    """
    l_out = o_ref.shape[-1]
    # Accumulate straight from ref slices (static offsets) -> shifted vector
    # loads + FMA on the VPU; no materialized shifted copies of the tile.
    acc = w_ref[0] * x_ref[:, 0:l_out].astype(jnp.float32)
    for k in range(1, ksize):
        acc = acc + w_ref[k] * x_ref[:, k:k + l_out].astype(jnp.float32)
    o_ref[...] = acc.astype(o_ref.dtype)


def conv1d_derivative(x, der_filter, resol, *, max_rows_per_tile=None):
    """Pallas equivalent of Conv1dDerivative.forward.

    x          : (N, 1, L)  (PyTorch NCW layout)
    der_filter : (1, 1, K)  fixed derivative stencil
    resol      : python float (e.g. 2*dt)
    returns    : (N, 1, L - K + 1), same dtype as x
    """
    n, c, l = x.shape
    assert c == 1, "Conv1dDerivative has a single input channel"
    ksize = int(der_filter.shape[-1])
    l_out = l - ksize + 1
    assert l_out >= 1, "input length must be >= kernel_size"

    # --- lane-dense output: pad length so l_out lands on a 128 multiple -----
    l_out_pad = _round_up(l_out, _LANE)
    l_pad = l_out_pad + ksize - 1

    # --- fold 1/resol into the taps (removes a full-tile VPU multiply) ------
    w = jnp.asarray(der_filter, jnp.float32).reshape(ksize) * jnp.float32(
        1.0 / float(resol)
    )

    # --- batch-axis tile size: ~2 MiB of input per tile, multiple of 8 ------
    itemsize = jnp.dtype(x.dtype).itemsize
    in_bytes_per_row = l_pad * itemsize
    rows = max(_SUBLANE, ((2 << 20) // in_bytes_per_row) // _SUBLANE * _SUBLANE)
    if max_rows_per_tile is not None:
        rows = min(rows, _round_up(int(max_rows_per_tile), _SUBLANE))
    tn = min(rows, _round_up(n, _SUBLANE))
    n_pad = _round_up(n, tn)

    x2 = x.reshape(n, l)
    if (n_pad, l_pad) != (n, l):
        x2 = jnp.pad(x2, ((0, n_pad - n), (0, l_pad - l)))

    grid = (n_pad // tn,)

    # Double-buffered input + output tiles (+ headroom), clamped to a range
    # that is safe on every generation (v5e/v6e/v7x).
    vmem_need = 2 * tn * (l_pad + l_out_pad) * itemsize
    vmem_limit = int(min(max(2 * vmem_need, 16 << 20), 32 << 20))

    kernel = functools.partial(_conv1d_deriv_kernel, ksize=ksize)

    out = pl.pallas_call(
        kernel,
        out_shape=jax.ShapeDtypeStruct((n_pad, l_out_pad), x.dtype),
        grid=grid,
        in_specs=[
            pl.BlockSpec(memory_space=pltpu.MemorySpace.SMEM),  # filter taps
            pl.BlockSpec((tn, l_pad), lambda i: (i, 0)),        # input tile
        ],
        out_specs=pl.BlockSpec((tn, l_out_pad), lambda i: (i, 0)),
        compiler_params=pltpu.CompilerParams(
            dimension_semantics=("parallel",),
            vmem_limit_bytes=vmem_limit,
        ),
    )(w, x2)

    # Crop padded rows / lanes with a cheap XLA slice.
    return out[:n, :l_out].reshape(n, 1, l_out)


def _reference(x, der_filter, resol):
    """Plain-JAX reference matching torch.nn.functional.conv1d (no padding)."""
    n, _, l = x.shape
    k = der_filter.shape[-1]
    l_out = l - k + 1
    w = jnp.asarray(der_filter, jnp.float32).reshape(k)
    x2 = x.reshape(n, l).astype(jnp.float32)
    acc = jnp.zeros((n, l_out), jnp.float32)
    for i in range(k):
        acc = acc + w[i] * x2[:, i:i + l_out]
    return (acc / resol).reshape(n, 1, l_out).astype(x.dtype)


if __name__ == "__main__":
    # Deterministic setup mirroring PhyCRNet's time-derivative operator:
    #   DerFilter = [[[-1, 0, 1]]], resol = 2*dt  -> central difference d/dt.
    dt = 0.002
    der_filter = jnp.asarray([[[-1.0, 0.0, 1.0]]], jnp.float32)  # (1, 1, 3)
    resol = 2.0 * dt

    key = jax.random.PRNGKey(0)
    k1, k2 = jax.random.split(key)

    # Case 1: small shape, single-tile path.
    x1 = jax.random.normal(k1, (8, 1, 16), dtype=jnp.float32)
    out1 = jax.block_until_ready(conv1d_derivative(x1, der_filter, resol))
    ref1 = _reference(x1, der_filter, resol)
    assert out1.shape == (8, 1, 14)
    assert jnp.allclose(out1, ref1, atol=1e-5, rtol=1e-5)

    # Case 2: batch-tiled grid path (30 rows -> 4 tiles of 8 rows, with
    # row/lane padding and lane-dense 256-wide output blocks).
    x2 = jax.random.normal(k2, (30, 1, 200), dtype=jnp.float32)
    out2 = jax.block_until_ready(
        conv1d_derivative(x2, der_filter, resol, max_rows_per_tile=8)
    )
    ref2 = _reference(x2, der_filter, resol)
    assert out2.shape == (30, 1, 198)
    assert jnp.allclose(out2, ref2, atol=1e-5, rtol=1e-5)

    print("KERNEL_OK")
</pallas_src>

<mosaic_0001>
module attributes {stable_mosaic.version = 11 : i64} {
  func.func @_conv1d_deriv_kernel(%arg0: i32, %arg1: memref<3xf32, #tpu.memory_space<smem>>, %arg2: memref<8x130xf32, #tpu.memory_space<vmem>>, %arg3: memref<8x128xf32, #tpu.memory_space<vmem>>) attributes {dimension_semantics = [#tpu.dimension_semantics<parallel>], iteration_bounds = array<i64: 1>, scalar_prefetch = 0 : i64, scratch_operands = 0 : i64, tpu.core_type = #tpu.core_type<tc>, window_params = [{transform_indices = @transform_0, window_bounds = array<i64: 3>}, {transform_indices = @transform_1, window_bounds = array<i64: 8, 130>}, {transform_indices = @transform_2, window_bounds = array<i64: 8, 128>}]} {
    %c0 = arith.constant 0 : index
    %0 = memref.load %arg1[%c0] : memref<3xf32, #tpu.memory_space<smem>>
    %c0_0 = arith.constant 0 : index
    %c0_1 = arith.constant 0 : index
    %1 = vector.load %arg2[%c0_0, %c0_1] : memref<8x130xf32, #tpu.memory_space<vmem>>, vector<8x128xf32>
    %2 = vector.broadcast %0 : f32 to vector<8x128xf32>
    %3 = arith.mulf %2, %1 : vector<8x128xf32>
    %c1 = arith.constant 1 : index
    %4 = memref.load %arg1[%c1] : memref<3xf32, #tpu.memory_space<smem>>
    %c0_2 = arith.constant 0 : index
    %c1_3 = arith.constant 1 : index
    %5 = vector.load %arg2[%c0_2, %c1_3] : memref<8x130xf32, #tpu.memory_space<vmem>>, vector<8x128xf32>
    %6 = vector.broadcast %4 : f32 to vector<8x128xf32>
    %7 = arith.mulf %6, %5 : vector<8x128xf32>
    %8 = arith.addf %3, %7 : vector<8x128xf32>
    %c2 = arith.constant 2 : index
    %9 = memref.load %arg1[%c2] : memref<3xf32, #tpu.memory_space<smem>>
    %c0_4 = arith.constant 0 : index
    %c2_5 = arith.constant 2 : index
    %10 = vector.load %arg2[%c0_4, %c2_5] : memref<8x130xf32, #tpu.memory_space<vmem>>, vector<8x128xf32>
    %11 = vector.broadcast %9 : f32 to vector<8x128xf32>
    %12 = arith.mulf %11, %10 : vector<8x128xf32>
    %13 = arith.addf %8, %12 : vector<8x128xf32>
    %c0_6 = arith.constant 0 : index
    %c0_7 = arith.constant 0 : index
    %14 = vector.load %arg3[%c0_6, %c0_7] : memref<8x128xf32, #tpu.memory_space<vmem>>, vector<8x128xf32>
    tpu.vector_store %arg3[%c0_6, %c0_7], %13 {strides = array<i32>} : memref<8x128xf32, #tpu.memory_space<vmem>>, vector<8x128xf32>,
    return
  }
  func.func @transform_0(%arg0: i32) -> i32 {
    %c0_i32 = arith.constant 0 : i32
    %c0_i32_0 = arith.constant 0 : i32
    return %c0_i32 : i32
  }
  func.func @transform_1(%arg0: i32) -> (i32, i32) {
    %c0_i32 = arith.constant 0 : i32
    %c0_i32_0 = arith.constant 0 : i32
    return %arg0, %c0_i32 : i32, i32
  }
  func.func @transform_2(%arg0: i32) -> (i32, i32) {
    %c0_i32 = arith.constant 0 : i32
    %c0_i32_0 = arith.constant 0 : i32
    return %arg0, %c0_i32 : i32, i32
  }
}

</mosaic_0001>

<bundles_post_ra>
// kernel: tpu_custom_call.1
= control target key start
LH: loop header
LB: loop body
LE: loop exit
PB: predicated region body
PF: predicated region fallthrough
CT: control target
= control target key end

     0   :  { %7 = vsyncpa [#allocation5], 0  ;;  %s209_s0 = inlined_call_operand.hbm [shape: f32[3], index: 0, kind: input, shape index: {}]   ;;  %s210_s1 = inlined_call_operand.hbm [shape: f32[8,130], index: 1, kind: input, shape index: {}]   ;;  %s211_s2 = inlined_call_operand.hbm [shape: f32[8,128], index: 2, kind: output, shape index: {}]  }
   0x1   :  { %8 = vsyncpa [#allocation3], 0 }
   0x2   :  { %9 = vsyncpa [#allocation4], 0  ;;  %s93_s11 = scalar_lea.hbm %s209_s0, 16 }
   0x3   :  { %p94_p0 = scmp.ne.s32.totalorder %s209_s0, %s93_s11  ;;  %p97_p1 = scmp.lt.u32.totalorder %s93_s11, %s209_s0 }
   0x5   :  { %p99_p2 = pnand %p97_p1, %p94_p0 }
   0x7   :  { %102 = shalt.err (!%p99_p2)
}
   0x8   :  { %s153_s16 = smov [#allocation2]   ;;  %s154_s19 = smov [#allocation6]  }
   0x9   :  { %17 = dma.hbm_to_smem %s209_s0, 16, %s153_s16, [#allocation5]  }
   0xa   :  { %s24_s20 = sshll.u32 %s154_s19, 4  ;;  %s103_s23 = scalar_lea.hbm %s210_s1, 256  ;;  %s25_s20 = int_to_ptr.vmem [resolvable:$true] %s24_s20 }
   0xb   :  { %p104_p3 = scmp.ne.s32.totalorder %s210_s1, %s103_s23  ;;  %p107_p4 = scmp.lt.u32.totalorder %s103_s23, %s210_s1 }
   0xd   :  { %p109_p5 = pnand %p107_p4, %p104_p3 }
   0xf   :  { %112 = shalt.err (!%p109_p5)
}
  0x10   :  { %s113_s28 = scalar_lea.vmem %s25_s20, 256  ;;  %p118_p7 = scmp.lt.s32.totalorder %s25_s20, %s25_s20 }
  0x11   :  { %p114_p6 = scmp.ne.s32.totalorder %s25_s20, %s113_s28  ;;  %p119_p8 = scmp.lt.s32.totalorder %s113_s28, %s113_s28 }
  0x13   :  { %p120_p9 = por %p119_p8, %p118_p7 }
  0x15   :  { %p121_p10 = pnand %p120_p9, %p114_p6 }
  0x17   :  { %124 = shalt.err (!%p121_p10)
}
  0x18   :  { %27 = dma.hbm_to_vmem [thread:$0]  %s210_s1, 256, %s25_s20, [#allocation3]  }
  0x19   :  { %147 = dma.done.wait [#allocation5], 16  }
  0x1a   :  { %148 = vsyncadd [#allocation5], 4294967280 }
  0x1b   :  { %149 = dma.done.wait [#allocation3], 256  }
  0x1c   :  { %150 = vsyncadd [#allocation3], 4294967040 }
  0x1d   :  { %34 = sfence }
  0x1e   :  { %s87_s30 = sld [smem:[#allocation2 + $0x2]]  ;;  %s86_s3 = sld [smem:[#allocation2 + $0x1]]  ;;  %v40_v0 = vld [vmem:[#allocation6] sm:$0xff]  ;;  %v41_v1 = vld [vmem:[#allocation6 + $0x8] sm:$0xff]  ;;  %vm51_vm0 = vcmask 1039360   ;;  %vm65_vm1 = vcmask 1031168  }
  0x1f   :  { %s155_s4 = smov 126   ;;  %s156_s5 = smov 127  }
  0x20   :  { %s35_s1 = sld [smem:[#allocation2]]  ;;  %s157_s6 = smov [#allocation7]  }
  0x21   :  { %s76_s7 = sshll.u32 %s157_s6, 4  ;;  %s77_s7 = int_to_ptr.vmem [resolvable:$true] %s76_s7 }
  0x22   :  { %s125_s8 = scalar_lea.vmem %s77_s7, 128  ;;  %p130_p12 = scmp.lt.s32.totalorder %s77_s7, %s77_s7 }
  0x23   :  { %p126_p11 = scmp.ne.s32.totalorder %s77_s7, %s125_s8  ;;  %p131_p13 = scmp.lt.s32.totalorder %s125_s8, %s125_s8 }
  0x24   :  { %v56_v2 = vstv %s87_s30  ;;  %v42_v4 = vstv %s86_s3 }
  0x25   :  { %v57_v3 = vmul.f32 %v56_v2, %v40_v0  ;;  %v43_v5 = vmul.f32 %v42_v4, %v40_v0  ;;  %v58_v6 = vmul.f32 %v56_v2, %v41_v1  ;;  %v44_v7 = vmul.f32 %v42_v4, %v41_v1  ;;  %p132_p0 = por %p131_p13, %p130_p12 }
  0x26   :  { %v37_v9 = vstv %s35_s1 }
  0x27   :  { %61 = vrot.lane.b32.xlu1 %v57_v3, %s155_s4  ;;  %47 = vrot.lane.b32.xlu0 %v43_v5, %s156_s5  ;;  %v38_v11 = vmul.f32 %v40_v0, %v37_v9  ;;  %p133_p1 = pnand %p132_p0, %p126_p11 }
  0x2b   :  { %63 = vrot.lane.b32.xlu1 %v58_v6, %s155_s4  ;;  %49 = vrot.lane.b32.xlu0 %v44_v7, %s156_s5 }
  0x99   :  { %v62_v8 = vpop.permute.xlu1 %61  ;;  %v48_v10 = vpop.permute.xlu0 %47 }
  0x9d   :  { %v64_v12 = vpop.permute.xlu1 %63  ;;  %v50_v13 = vpop.permute.xlu0 %49 }
  0x9e   :  { %v52_v14 = vsel %vm51_vm0, %v48_v10, %v50_v13  ;;  %v66_v16 = vsel %vm65_vm1, %v62_v8, %v64_v12 }
  0x9f   :  { %v54_v15 = vadd.f32 %v52_v14, %v38_v11 }
  0xa1   :  { %v68_v17 = vadd.f32 %v66_v16, %v54_v15 }
  0xa3   :  { %69 = vst [vmem:[#allocation7] sm:$0xff] %v68_v17 }
  0xa4   :  { %136 = shalt.err (!%p133_p1)
}
  0xa5   :  { %s137_s11 = scalar_lea.hbm %s211_s2, 128 }
  0xa6   :  { %p138_p2 = scmp.ne.s32.totalorder %s211_s2, %s137_s11  ;;  %p141_p3 = scmp.lt.u32.totalorder %s137_s11, %s211_s2 }
  0xa8   :  { %p143_p4 = pnand %p141_p3, %p138_p2 }
  0xaa   :  { %146 = shalt.err (!%p143_p4)
}
  0xab   :  { %79 = dma.vmem_to_hbm [thread:$0]  %s77_s7, 128, %s211_s2, [#allocation4]  }
  0xac   :  { %151 = dma.done.wait [#allocation4], 128  }
  0xad   :  { %152 = vsyncadd [#allocation4], 4294967168 }
  0xae   :  { %83 = vsyncpa [#allocation3], 1 }
  0xaf   :  { %84 = vsyncpa [#allocation4], 1 }
  0xb0   :  { %85 = vsyncpa [#allocation5], 1 }

</bundles_post_ra>
